<compile_context>
chip_gen: v6e
topology: v6e:2x2x1
jax: 0.10.0
libtpu: 0.0.40
codegen_flags: <defaults>
</compile_context>

<pallas_src>
import functools

import jax
import jax.numpy as jnp
from jax.experimental import pallas as pl
from jax.experimental.pallas import tpu as pltpu

LANE = 128
SUBLANE = 8


def _round_up(n, m):
    return ((n + m - 1) // m) * m


def _pad_to(a, shape):
    return jnp.pad(a, [(0, s - d) for d, s in zip(a.shape, shape)])


def _sigmoid(x):
    # sigmoid(x) == 0.5 * tanh(0.5 * x) + 0.5 : one EUP op, no VALU divide.
    return 0.5 * jnp.tanh(0.5 * x) + 0.5


def _mlp_kernel(x_ref, w1_ref, b1_ref, w2_ref, b2_ref, w3_ref, b3_ref, out_ref):
    """Fused fc1 -> sigmoid -> fc2 -> sigmoid -> fc3 on one (TB, .) batch tile.

    Weights are pre-transposed to (in, out) and lane-padded (hidden 100 -> 128,
    out 3 -> 128) so every matmul operand is lane-dense.  Padded hidden units come
    out as sigmoid(0) = 0.5 but multiply zero rows of the next layer's weights, so
    they contribute nothing.  Only the real output columns (3) are stored.
    """
    out_dim = out_ref.shape[-1]
    x = x_ref[...]
    h1 = _sigmoid(
        jnp.dot(x.astype(w1_ref.dtype), w1_ref[...],
                preferred_element_type=jnp.float32) + b1_ref[...])
    h2 = _sigmoid(
        jnp.dot(h1.astype(w2_ref.dtype), w2_ref[...],
                preferred_element_type=jnp.float32) + b2_ref[...])
    y = jnp.dot(h2.astype(w3_ref.dtype), w3_ref[...],
                preferred_element_type=jnp.float32) + b3_ref[...]
    out_ref[...] = y[:, :out_dim].astype(out_ref.dtype)


def prepare_params(params, compute_dtype=jnp.float32):
    """One-time parameter prep (hoisted out of the per-call path).

    params in PyTorch layout: w1 (100, 2), b1 (100,), w2 (100, 100), b2 (100,),
    w3 (3, 100), b3 (3,).  Returns (prepared_dict, meta_dict).
    Biases stay f32 (they are added to the f32 MXU accumulator).
    """
    in_dim = params["w1"].shape[1]
    h_dim = params["w1"].shape[0]
    out_dim = params["w3"].shape[0]
    hp = _round_up(h_dim, LANE)    # 100 -> 128
    op = _round_up(out_dim, LANE)  # 3   -> 128 (lane-dense final matmul)

    prepared = dict(
        w1=_pad_to(params["w1"].T, (in_dim, hp)).astype(compute_dtype),
        b1=_pad_to(params["b1"][None, :], (1, hp)).astype(jnp.float32),
        w2=_pad_to(params["w2"].T, (hp, hp)).astype(compute_dtype),
        b2=_pad_to(params["b2"][None, :], (1, hp)).astype(jnp.float32),
        w3=_pad_to(params["w3"].T, (hp, op)).astype(compute_dtype),
        b3=_pad_to(params["b3"][None, :], (1, op)).astype(jnp.float32),
    )
    meta = dict(in_dim=in_dim, h_dim=h_dim, out_dim=out_dim, hp=hp, op=op)
    return prepared, meta


def mlp_forward(x, prepared, meta, *, block_rows=512):
    """x: (B, in_dim) float32 -> (B, out_dim) float32."""
    B, in_dim = x.shape
    out_dim = meta["out_dim"]
    hp, op = meta["hp"], meta["op"]

    # Sublane-aligned batch tile; pad batch up to a multiple of it so every block is full.
    tb = _round_up(min(block_rows, _round_up(B, SUBLANE)), SUBLANE)
    bp = _round_up(B, tb)
    if bp != B:
        x = jnp.pad(x, ((0, bp - B), (0, 0)))

    def x_map(i):
        return (i, 0)

    def const_map(i):  # weights / biases: same block every step -> DMA'd once, resident
        return (0, 0)

    out = pl.pallas_call(
        _mlp_kernel,
        out_shape=jax.ShapeDtypeStruct((bp, out_dim), jnp.float32),
        grid=(bp // tb,),
        in_specs=[
            pl.BlockSpec((tb, in_dim), x_map),
            pl.BlockSpec((in_dim, hp), const_map),
            pl.BlockSpec((1, hp), const_map),
            pl.BlockSpec((hp, hp), const_map),
            pl.BlockSpec((1, hp), const_map),
            pl.BlockSpec((hp, op), const_map),
            pl.BlockSpec((1, op), const_map),
        ],
        out_specs=pl.BlockSpec((tb, out_dim), x_map),
        compiler_params=pltpu.CompilerParams(dimension_semantics=("parallel",)),
    )(x, prepared["w1"], prepared["b1"], prepared["w2"], prepared["b2"],
      prepared["w3"], prepared["b3"])

    if bp != B:
        out = out[:B]
    return out


def reference_forward(x, p):
    """Pure-JAX reference matching the PyTorch MLP (highest precision matmuls)."""
    hi = jax.lax.Precision.HIGHEST
    h1 = jax.nn.sigmoid(jnp.dot(x, p["w1"].T, precision=hi) + p["b1"])
    h2 = jax.nn.sigmoid(jnp.dot(h1, p["w2"].T, precision=hi) + p["b2"])
    return jnp.dot(h2, p["w3"].T, precision=hi) + p["b3"]


if __name__ == "__main__":
    # Module hyperparameters (from the PyTorch spec).
    in_dim, h_dim, out_dim = 2, 100, 3
    B = 2

    key = jax.random.PRNGKey(0)
    keys = jax.random.split(key, 8)

    def u(kk, shape, fan_in):
        k = 1.0 / float(jnp.sqrt(fan_in))
        return jax.random.uniform(kk, shape, jnp.float32, -k, k)

    # PyTorch-native parameter shapes (nn.Linear default init bounds).
    params = dict(
        w1=u(keys[0], (h_dim, in_dim), in_dim),
        b1=u(keys[1], (h_dim,), in_dim),
        w2=u(keys[2], (h_dim, h_dim), h_dim),
        b2=u(keys[3], (h_dim,), h_dim),
        w3=u(keys[4], (out_dim, h_dim), h_dim),
        b3=u(keys[5], (out_dim,), h_dim),
    )

    # One-time prep (f32 and bf16-MXU variants).
    prepared_f32, meta = prepare_params(params, compute_dtype=jnp.float32)
    prepared_bf16, _ = prepare_params(params, compute_dtype=jnp.bfloat16)

    fwd_f32 = jax.jit(functools.partial(mlp_forward, prepared=prepared_f32, meta=meta))
    fwd_f32_small_tile = jax.jit(
        functools.partial(mlp_forward, prepared=prepared_f32, meta=meta, block_rows=8))
    fwd_bf16 = jax.jit(functools.partial(mlp_forward, prepared=prepared_bf16, meta=meta))

    # 1) Spec-sized input, f32 path, tight tolerance.
    x = jax.random.normal(keys[6], (B, in_dim), jnp.float32)
    out = jax.block_until_ready(fwd_f32(x))
    ref = reference_forward(x, params)
    assert out.shape == (B, out_dim), out.shape
    assert jnp.allclose(out, ref, rtol=1e-4, atol=1e-4), (out, ref)

    # 2) Multi-block grid (B=32, TB=8 -> 4 grid steps, weights stay resident).
    x2 = jax.random.normal(keys[7], (32, in_dim), jnp.float32)
    out2 = jax.block_until_ready(fwd_f32_small_tile(x2))
    ref2 = reference_forward(x2, params)
    assert out2.shape == (32, out_dim), out2.shape
    assert jnp.allclose(out2, ref2, rtol=1e-4, atol=1e-4), (out2, ref2)

    # 3) bf16 MXU path (f32 accumulation), loose tolerance.
    out3 = jax.block_until_ready(fwd_bf16(x2))
    assert out3.shape == (32, out_dim), out3.shape
    assert jnp.allclose(out3, ref2, rtol=1e-1, atol=1e-1), (out3, ref2)

    print("KERNEL_OK")
</pallas_src>

<mosaic_0001>
module attributes {stable_mosaic.version = 11 : i64} {
  func.func @_mlp_kernel(%arg0: i32, %arg1: memref<8x2xf32, #tpu.memory_space<vmem>>, %arg2: memref<2x128xf32, #tpu.memory_space<vmem>>, %arg3: memref<1x128xf32, #tpu.memory_space<vmem>>, %arg4: memref<128x128xf32, #tpu.memory_space<vmem>>, %arg5: memref<1x128xf32, #tpu.memory_space<vmem>>, %arg6: memref<128x128xf32, #tpu.memory_space<vmem>>, %arg7: memref<1x128xf32, #tpu.memory_space<vmem>>, %arg8: memref<8x3xf32, #tpu.memory_space<vmem>>) attributes {dimension_semantics = [#tpu.dimension_semantics<parallel>], iteration_bounds = array<i64: 1>, scalar_prefetch = 0 : i64, scratch_operands = 0 : i64, tpu.core_type = #tpu.core_type<tc>, window_params = [{transform_indices = @transform_0, window_bounds = array<i64: 8, 2>}, {pipeline_mode = #tpu.pipeline_mode<synchronous>, transform_indices = @transform_1, window_bounds = array<i64: 2, 128>}, {pipeline_mode = #tpu.pipeline_mode<synchronous>, transform_indices = @transform_2, window_bounds = array<i64: 1, 128>}, {pipeline_mode = #tpu.pipeline_mode<synchronous>, transform_indices = @transform_3, window_bounds = array<i64: 128, 128>}, {pipeline_mode = #tpu.pipeline_mode<synchronous>, transform_indices = @transform_4, window_bounds = array<i64: 1, 128>}, {pipeline_mode = #tpu.pipeline_mode<synchronous>, transform_indices = @transform_5, window_bounds = array<i64: 128, 128>}, {pipeline_mode = #tpu.pipeline_mode<synchronous>, transform_indices = @transform_6, window_bounds = array<i64: 1, 128>}, {transform_indices = @transform_7, window_bounds = array<i64: 8, 3>}]} {
    %c0 = arith.constant 0 : index
    %c0_0 = arith.constant 0 : index
    %0 = vector.load %arg1[%c0, %c0_0] : memref<8x2xf32, #tpu.memory_space<vmem>>, vector<8x2xf32>
    %c0_1 = arith.constant 0 : index
    %c0_2 = arith.constant 0 : index
    %1 = vector.load %arg2[%c0_1, %c0_2] : memref<2x128xf32, #tpu.memory_space<vmem>>, vector<2x128xf32>
    %cst = arith.constant dense<0.000000e+00> : vector<8x128xf32>
    %2 = tpu.matmul %0, %1, %cst {dimension_numbers = #tpu.dot_dimension_numbers<[1], [0], [0], [1], [0, 0, 1, 1], [], []>} : vector<8x2xf32>, vector<2x128xf32>, vector<8x128xf32> -> vector<8x128xf32>
    %c0_3 = arith.constant 0 : index
    %c0_4 = arith.constant 0 : index
    %3 = vector.load %arg3[%c0_3, %c0_4] : memref<1x128xf32, #tpu.memory_space<vmem>>, vector<1x128xf32>
    %4 = vector.broadcast %3 : vector<1x128xf32> to vector<8x128xf32>
    %5 = arith.addf %2, %4 : vector<8x128xf32>
    %cst_5 = arith.constant 5.000000e-01 : f32
    %6 = vector.broadcast %cst_5 : f32 to vector<8x128xf32>
    %7 = arith.mulf %6, %5 : vector<8x128xf32>
    %8 = math.tanh %7 : vector<8x128xf32>
    %cst_6 = arith.constant 5.000000e-01 : f32
    %9 = vector.broadcast %cst_6 : f32 to vector<8x128xf32>
    %10 = arith.mulf %9, %8 : vector<8x128xf32>
    %cst_7 = arith.constant 5.000000e-01 : f32
    %11 = vector.broadcast %cst_7 : f32 to vector<8x128xf32>
    %12 = arith.addf %10, %11 : vector<8x128xf32>
    %c0_8 = arith.constant 0 : index
    %c0_9 = arith.constant 0 : index
    %13 = vector.load %arg4[%c0_8, %c0_9] : memref<128x128xf32, #tpu.memory_space<vmem>>, vector<128x128xf32>
    %cst_10 = arith.constant dense<0.000000e+00> : vector<8x128xf32>
    %14 = tpu.matmul %12, %13, %cst_10 {dimension_numbers = #tpu.dot_dimension_numbers<[1], [0], [0], [1], [0, 0, 1, 1], [], []>} : vector<8x128xf32>, vector<128x128xf32>, vector<8x128xf32> -> vector<8x128xf32>
    %c0_11 = arith.constant 0 : index
    %c0_12 = arith.constant 0 : index
    %15 = vector.load %arg5[%c0_11, %c0_12] : memref<1x128xf32, #tpu.memory_space<vmem>>, vector<1x128xf32>
    %16 = vector.broadcast %15 : vector<1x128xf32> to vector<8x128xf32>
    %17 = arith.addf %14, %16 : vector<8x128xf32>
    %cst_13 = arith.constant 5.000000e-01 : f32
    %18 = vector.broadcast %cst_13 : f32 to vector<8x128xf32>
    %19 = arith.mulf %18, %17 : vector<8x128xf32>
    %20 = math.tanh %19 : vector<8x128xf32>
    %cst_14 = arith.constant 5.000000e-01 : f32
    %21 = vector.broadcast %cst_14 : f32 to vector<8x128xf32>
    %22 = arith.mulf %21, %20 : vector<8x128xf32>
    %cst_15 = arith.constant 5.000000e-01 : f32
    %23 = vector.broadcast %cst_15 : f32 to vector<8x128xf32>
    %24 = arith.addf %22, %23 : vector<8x128xf32>
    %c0_16 = arith.constant 0 : index
    %c0_17 = arith.constant 0 : index
    %25 = vector.load %arg6[%c0_16, %c0_17] : memref<128x128xf32, #tpu.memory_space<vmem>>, vector<128x128xf32>
    %cst_18 = arith.constant dense<0.000000e+00> : vector<8x128xf32>
    %26 = tpu.matmul %24, %25, %cst_18 {dimension_numbers = #tpu.dot_dimension_numbers<[1], [0], [0], [1], [0, 0, 1, 1], [], []>} : vector<8x128xf32>, vector<128x128xf32>, vector<8x128xf32> -> vector<8x128xf32>
    %c0_19 = arith.constant 0 : index
    %c0_20 = arith.constant 0 : index
    %27 = vector.load %arg7[%c0_19, %c0_20] : memref<1x128xf32, #tpu.memory_space<vmem>>, vector<1x128xf32>
    %28 = vector.broadcast %27 : vector<1x128xf32> to vector<8x128xf32>
    %29 = arith.addf %26, %28 : vector<8x128xf32>
    %30 = vector.extract_strided_slice %29 {offsets = [0, 0], sizes = [8, 3], strides = [1, 1]} : vector<8x128xf32> to vector<8x3xf32>
    %c0_21 = arith.constant 0 : index
    %c0_22 = arith.constant 0 : index
    %31 = vector.load %arg8[%c0_21, %c0_22] : memref<8x3xf32, #tpu.memory_space<vmem>>, vector<8x3xf32>
    tpu.vector_store %arg8[%c0_21, %c0_22], %30 {strides = array<i32>} : memref<8x3xf32, #tpu.memory_space<vmem>>, vector<8x3xf32>,
    return
  }
  func.func @transform_0(%arg0: i32) -> (i32, i32) {
    %c0_i32 = arith.constant 0 : i32
    %c0_i32_0 = arith.constant 0 : i32
    return %arg0, %c0_i32 : i32, i32
  }
  func.func @transform_1(%arg0: i32) -> (i32, i32) {
    %c0_i32 = arith.constant 0 : i32
    %c0_i32_0 = arith.constant 0 : i32
    %c0_i32_1 = arith.constant 0 : i32
    return %c0_i32, %c0_i32_0 : i32, i32
  }
  func.func @transform_2(%arg0: i32) -> (i32, i32) {
    %c0_i32 = arith.constant 0 : i32
    %c0_i32_0 = arith.constant 0 : i32
    %c0_i32_1 = arith.constant 0 : i32
    return %c0_i32, %c0_i32_0 : i32, i32
  }
  func.func @transform_3(%arg0: i32) -> (i32, i32) {
    %c0_i32 = arith.constant 0 : i32
    %c0_i32_0 = arith.constant 0 : i32
    %c0_i32_1 = arith.constant 0 : i32
    return %c0_i32, %c0_i32_0 : i32, i32
  }
  func.func @transform_4(%arg0: i32) -> (i32, i32) {
    %c0_i32 = arith.constant 0 : i32
    %c0_i32_0 = arith.constant 0 : i32
    %c0_i32_1 = arith.constant 0 : i32
    return %c0_i32, %c0_i32_0 : i32, i32
  }
  func.func @transform_5(%arg0: i32) -> (i32, i32) {
    %c0_i32 = arith.constant 0 : i32
    %c0_i32_0 = arith.constant 0 : i32
    %c0_i32_1 = arith.constant 0 : i32
    return %c0_i32, %c0_i32_0 : i32, i32
  }
  func.func @transform_6(%arg0: i32) -> (i32, i32) {
    %c0_i32 = arith.constant 0 : i32
    %c0_i32_0 = arith.constant 0 : i32
    %c0_i32_1 = arith.constant 0 : i32
    return %c0_i32, %c0_i32_0 : i32, i32
  }
  func.func @transform_7(%arg0: i32) -> (i32, i32) {
    %c0_i32 = arith.constant 0 : i32
    %c0_i32_0 = arith.constant 0 : i32
    return %arg0, %c0_i32 : i32, i32
  }
}

</mosaic_0001>

<bundles_post_ra>
// kernel: mlp_forward.1
= control target key start
LH: loop header
LB: loop body
LE: loop exit
PB: predicated region body
PF: predicated region fallthrough
CT: control target
= control target key end

     0   :  { %12 = vsyncpa [#allocation3], 0  ;;  %s622_s0 = inlined_call_operand.vmem [shape: f32[8,2], index: 0, kind: input, shape index: {}]   ;;  %s623_s1 = inlined_call_operand.vmem [shape: f32[2,128], index: 1, kind: input, shape index: {}]   ;;  %s624_s2 = inlined_call_operand.vmem [shape: f32[1,128], index: 2, kind: input, shape index: {}]   ;;  %s625_s3 = inlined_call_operand.hbm [shape: f32[128,128], index: 3, kind: input, shape index: {}]   ;;  %s626_s4 = inlined_call_operand.vmem [shape: f32[1,128], index: 4, kind: input, shape index: {}]   ;;  %s627_s5 = inlined_call_operand.hbm [shape: f32[128,128], index: 5, kind: input, shape index: {}]   ;;  %s628_s6 = inlined_call_operand.vmem [shape: f32[1,128], index: 6, kind: input, shape index: {}]   ;;  %s629_s7 = inlined_call_operand.vmem [shape: f32[8,3], index: 7, kind: output, shape index: {}]  }
   0x1   :  { %13 = vsyncpa [#allocation5], 0  ;;  %s513_s24 = smov [#allocation2]  }
   0x2   :  { %s25_s25 = sshll.u32 %s513_s24, 4  ;;  %s26_s25 = int_to_ptr.vmem [resolvable:$true] %s25_s25 }
   0x3   :  { %s477_s26 = scalar_lea.vmem %s26_s25, 2048  ;;  %p482_p1 = scmp.lt.s32.totalorder %s26_s25, %s26_s25 }
   0x4   :  { %p478_p0 = scmp.ne.s32.totalorder %s26_s25, %s477_s26  ;;  %p483_p2 = scmp.lt.s32.totalorder %s477_s26, %s477_s26 }
   0x6   :  { %p484_p3 = por %p483_p2, %p482_p1 }
   0x8   :  { %p485_p4 = pnand %p484_p3, %p478_p0 }
   0xa   :  { %488 = shalt.err (!%p485_p4)
}
   0xb   :  { %s514_s27 = smov 128   ;;  %s515_s28 = smov 8  }
   0xc   :  { %31 = dma.hbm_to_vmem [thread:$0]  %s625_s3, 2048, %s26_s25, [#allocation3], %s514_s27, %s514_s27, %s515_s28  }
   0xd   :  { %s516_s8 = smov [#allocation4]  }
   0xe   :  { %s39_s9 = sshll.u32 %s516_s8, 4  ;;  %s40_s9 = int_to_ptr.vmem [resolvable:$true] %s39_s9 }
   0xf   :  { %s497_s10 = scalar_lea.vmem %s40_s9, 2048  ;;  %p502_p6 = scmp.lt.s32.totalorder %s40_s9, %s40_s9 }
  0x10   :  { %p498_p5 = scmp.ne.s32.totalorder %s40_s9, %s497_s10  ;;  %p503_p7 = scmp.lt.s32.totalorder %s497_s10, %s497_s10 }
  0x12   :  { %p504_p8 = por %p503_p7, %p502_p6 }
  0x14   :  { %p505_p9 = pnand %p504_p8, %p498_p5 }
  0x16   :  { %508 = shalt.err (!%p505_p9)
}
  0x17   :  { %45 = dma.hbm_to_vmem [thread:$0]  %s627_s5, 2048, %s40_s9, [#allocation5], %s514_s27, %s514_s27, %s515_s28  }
  0x18   :  { %509 = dma.done.wait [#allocation3], 2048  }
  0x19   :  { %510 = vsyncadd [#allocation3], 4294965248 }
  0x1a   :  { %511 = dma.done.wait [#allocation5], 2048  }
  0x1b   :  { %512 = vsyncadd [#allocation5], 4294965248  ;;  %v517_v0 = vmov 0.0   ;;  %vm518_vm0 = vmmov 0   ;;  %vm67_vm1 = vcmask 1041408   ;;  %vm63_vm2 = vcmask 15360  }
  0x1c   :  { %384 = vmatprep.subr.mxu0 %v517_v0  ;;  %386 = vmatprep.mubr.msk.f32.mxu0 %vm518_vm0, %v517_v0  ;;  %v55_v1 = vld [vmem:[%s623_s1] sm:$0x3]  ;;  %v160_v3 = vld [vmem:[#allocation2 + $0x78] sm:$0xff]  ;;  %v159_v4 = vld [vmem:[#allocation2 + $0x70] sm:$0xff]  ;;  %vm335_vm3 = vcmask 23552  }
  0x1d   :  { %389 = vmatprep.subr.mxu1 %v517_v0  ;;  %421 = vmatprep.mubr.msk.f32.mxu1 %vm518_vm0, %v517_v0  ;;  %v54_v2 = vld [vmem:[%s622_s0] sm:$0xff]  ;;  %v158_v5 = vld [vmem:[#allocation2 + $0x68] sm:$0xff]  ;;  %v156_v7 = vld [vmem:[#allocation2 + $0x58] sm:$0xff] }
  0x1e   :  { %385 = vmatpush3.msk.msra.mxu0 %vm67_vm1, %v55_v1  ;;  %390 = vmatpush3.msra.mxu1 %v160_v3  ;;  %v157_v6 = vld [vmem:[#allocation2 + $0x60] sm:$0xff]  ;;  %v155_v8 = vld [vmem:[#allocation2 + $0x50] sm:$0xff]  ;;  %v154_v9 = vld [vmem:[#allocation2 + $0x48] sm:$0xff] }
  0x1f   :  { %387 = vmatmul.mubr.msk.f32.vlgmr.msra.gmra.mxu0 %vm63_vm2, %v54_v2  ;;  %391 = vmatprep.subr.mxu1 %v517_v0  ;;  %v153_v10 = vld [vmem:[#allocation2 + $0x40] sm:$0xff]  ;;  %v152_v11 = vld [vmem:[#allocation2 + $0x38] sm:$0xff]  ;;  %v151_v12 = vld [vmem:[#allocation2 + $0x30] sm:$0xff] }
  0x20   :  { %392 = vmatpush3.msra.mxu1 %v159_v4  ;;  %424 = vmatprep.subr.mxu0 %v517_v0  ;;  %v150_v13 = vld [vmem:[#allocation2 + $0x28] sm:$0xff]  ;;  %v149_v14 = vld [vmem:[#allocation2 + $0x20] sm:$0xff]  ;;  %v148_v15 = vld [vmem:[#allocation2 + $0x18] sm:$0xff] }
  0x21   :  { %393 = vmatprep.subr.mxu1 %v517_v0  ;;  %456 = vmatprep.mubr.msk.f32.mxu0 %vm518_vm0, %v517_v0  ;;  %v147_v16 = vld [vmem:[#allocation2 + $0x10] sm:$0xff]  ;;  %v146_v17 = vld [vmem:[#allocation2 + $0x8] sm:$0xff]  ;;  %v145_v18 = vld [vmem:[#allocation2] sm:$0xff] }
  0x22   :  { %394 = vmatpush3.msra.mxu1 %v158_v5  ;;  %v257_v19 = vld [vmem:[#allocation4 + $0x78] sm:$0xff]  ;;  %v256_v20 = vld [vmem:[#allocation4 + $0x70] sm:$0xff]  ;;  %v255_v21 = vld [vmem:[#allocation4 + $0x68] sm:$0xff] }
  0x23   :  { %395 = vmatprep.subr.mxu1 %v517_v0  ;;  %425 = vmatpush3.msra.mxu0 %v257_v19  ;;  %v254_v22 = vld [vmem:[#allocation4 + $0x60] sm:$0xff]  ;;  %v253_v31 = vld [vmem:[#allocation4 + $0x58] sm:$0xff]  ;;  %v252_v32 = vld [vmem:[#allocation4 + $0x50] sm:$0xff] }
  0x24   :  { %396 = vmatpush3.msra.mxu1 %v157_v6  ;;  %426 = vmatprep.subr.mxu0 %v517_v0  ;;  %v343_v23 = vld [vmem:[%s624_s2] ss:$0 sm:$0xff]  ;;  %v251_v33 = vld [vmem:[#allocation4 + $0x48] sm:$0xff]  ;;  %v249_v35 = vld [vmem:[#allocation4 + $0x38] sm:$0xff] }
  0x25   :  { %397 = vmatprep.subr.mxu1 %v517_v0  ;;  %427 = vmatpush3.msra.mxu0 %v256_v20  ;;  %v250_v34 = vld [vmem:[#allocation4 + $0x40] sm:$0xff]  ;;  %v248_v36 = vld [vmem:[#allocation4 + $0x30] sm:$0xff]  ;;  %v247_v37 = vld [vmem:[#allocation4 + $0x28] sm:$0xff] }
  0x26   :  { %398 = vmatpush3.msra.mxu1 %v156_v7  ;;  %428 = vmatprep.subr.mxu0 %v517_v0  ;;  %v246_v38 = vld [vmem:[#allocation4 + $0x20] sm:$0xff]  ;;  %v245_v39 = vld [vmem:[#allocation4 + $0x18] sm:$0xff]  ;;  %v244_v40 = vld [vmem:[#allocation4 + $0x10] sm:$0xff] }
  0x27   :  { %399 = vmatprep.subr.mxu1 %v517_v0  ;;  %429 = vmatpush3.msra.mxu0 %v255_v21  ;;  %v243_v41 = vld [vmem:[#allocation4 + $0x8] sm:$0xff]  ;;  %v242_v42 = vld [vmem:[#allocation4] sm:$0xff] }
  0x28   :  { %400 = vmatpush3.msra.mxu1 %v155_v8  ;;  %430 = vmatprep.subr.mxu0 %v517_v0  ;;  %v346_v43 = vld [vmem:[%s626_s4] ss:$0 sm:$0xff] }
  0x29   :  { %401 = vmatprep.subr.mxu1 %v517_v0  ;;  %431 = vmatpush3.msra.mxu0 %v254_v22  ;;  %v347_v51 = vld [vmem:[%s628_s6] ss:$0 sm:$0xff] }
  0x2a   :  { %402 = vmatpush3.msra.mxu1 %v154_v9  ;;  %432 = vmatprep.subr.mxu0 %v517_v0 }
  0x2b   :  { %403 = vmatprep.subr.mxu1 %v517_v0  ;;  %433 = vmatpush3.msra.mxu0 %v253_v31 }
  0x2c   :  { %404 = vmatpush3.msra.mxu1 %v153_v10  ;;  %434 = vmatprep.subr.mxu0 %v517_v0 }
  0x2d   :  { %405 = vmatprep.subr.mxu1 %v517_v0  ;;  %435 = vmatpush3.msra.mxu0 %v252_v32 }
  0x2e   :  { %406 = vmatpush3.msra.mxu1 %v152_v11  ;;  %436 = vmatprep.subr.mxu0 %v517_v0 }
  0x2f   :  { %407 = vmatprep.subr.mxu1 %v517_v0  ;;  %437 = vmatpush3.msra.mxu0 %v251_v33 }
  0x30   :  { %408 = vmatpush3.msra.mxu1 %v151_v12  ;;  %438 = vmatprep.subr.mxu0 %v517_v0 }
  0x31   :  { %409 = vmatprep.subr.mxu1 %v517_v0  ;;  %439 = vmatpush3.msra.mxu0 %v250_v34 }
  0x32   :  { %410 = vmatpush3.msra.mxu1 %v150_v13  ;;  %440 = vmatprep.subr.mxu0 %v517_v0 }
  0x33   :  { %411 = vmatprep.subr.mxu1 %v517_v0  ;;  %441 = vmatpush3.msra.mxu0 %v249_v35 }
  0x34   :  { %412 = vmatpush3.msra.mxu1 %v149_v14  ;;  %442 = vmatprep.subr.mxu0 %v517_v0 }
  0x35   :  { %413 = vmatprep.subr.mxu1 %v517_v0  ;;  %443 = vmatpush3.msra.mxu0 %v248_v36 }
  0x36   :  { %414 = vmatpush3.msra.mxu1 %v148_v15  ;;  %444 = vmatprep.subr.mxu0 %v517_v0 }
  0x37   :  { %415 = vmatprep.subr.mxu1 %v517_v0  ;;  %445 = vmatpush3.msra.mxu0 %v247_v37 }
  0x38   :  { %416 = vmatpush3.msra.mxu1 %v147_v16  ;;  %446 = vmatprep.subr.mxu0 %v517_v0 }
  0x39   :  { %417 = vmatprep.subr.mxu1 %v517_v0  ;;  %447 = vmatpush3.msra.mxu0 %v246_v38 }
  0x3a   :  { %418 = vmatpush3.msra.mxu1 %v146_v17  ;;  %448 = vmatprep.subr.mxu0 %v517_v0 }
  0x3b   :  { %419 = vmatprep.subr.mxu1 %v517_v0  ;;  %449 = vmatpush3.msra.mxu0 %v245_v39 }
  0x3c   :  { %420 = vmatpush3.msra.mxu1 %v145_v18  ;;  %450 = vmatprep.subr.mxu0 %v517_v0 }
  0x3d   :  { %451 = vmatpush3.msra.mxu0 %v244_v40 }
  0x3e   :  { %452 = vmatprep.subr.mxu0 %v517_v0 }
  0x3f   :  { %453 = vmatpush3.msra.mxu0 %v243_v41 }
  0x40   :  { %454 = vmatprep.subr.mxu0 %v517_v0 }
  0x41   :  { %455 = vmatpush3.msra.mxu0 %v242_v42 }
  0xdf   :  { %v137_v24 = vpop.f32.mrf.mxu0 }
  0xe0   :  { %v138_v25 = vadd.f32 %v343_v23, %v137_v24 }
  0xe1   :  { %v388_v26 = vpop.f32.mrf.mxu0 }
  0xe2   :  { %v141_v27 = vmul.f32 0.5, %v138_v25 }
  0xe4   :  { %465 = vtanh.f32 %v141_v27 }
  0xf1   :  { %v466_v28 = vpop.eup %465 }
  0xf2   :  { %v143_v29 = vmul.f32 0.5, %v466_v28 }
  0xf4   :  { %v144_v30 = vadd.f32 0.5, %v143_v29 }
  0xf6   :  { %422 = vmatmul.mubr.f32.vlgmr.msra.gmra.mxu1 %v144_v30 }
 0x1b6   :  { %v234_v44 = vpop.f32.mrf.mxu1 }
 0x1b7   :  { %v235_v45 = vadd.f32 %v346_v43, %v234_v44 }
 0x1b8   :  { %v423_v46 = vpop.f32.mrf.mxu1 }
 0x1b9   :  { %v238_v47 = vmul.f32 0.5, %v235_v45 }
 0x1bb   :  { %467 = vtanh.f32 %v238_v47 }
 0x1c8   :  { %v468_v48 = vpop.eup %467 }
 0x1c9   :  { %v240_v49 = vmul.f32 0.5, %v468_v48 }
 0x1cb   :  { %v241_v50 = vadd.f32 0.5, %v240_v49 }
 0x1cd   :  { %457 = vmatmul.mubr.f32.vlgmr.msra.gmra.mxu0 %v241_v50 }
 0x28d   :  { %v331_v52 = vpop.f32.mrf.mxu0 }
 0x28e   :  { %v332_v53 = vadd.f32 %v347_v51, %v331_v52 }
 0x28f   :  { %v458_v54 = vpop.f32.mrf.mxu0 }
 0x290   :  { %336 = vst.msk [vmem:[%s629_s7] sm:$0xff] %vm335_vm3, %v332_v53 }
 0x291   :  { %341 = vsyncpa [#allocation3], 1 }
 0x292   :  { %342 = vsyncpa [#allocation5], 1 }

</bundles_post_ra>
